<compile_context>
chip_gen: v7x
topology: tpu7x:2x2x1
jax: 0.10.0
libtpu: 0.0.40
codegen_flags: <defaults>
</compile_context>

<pallas_src>
import math
from functools import partial

import jax
import jax.numpy as jnp
from jax.experimental import pallas as pl
from jax.experimental.pallas import tpu as pltpu

_LANE = 128
_SUBLANE = 8
_TARGET_TILE_BYTES = 2 * 1024 * 1024     # ~2 MiB output tile per grid step
_SMALL_TABLE_BYTES = 2 * 1024 * 1024     # VMEM-resident table fast-path threshold
_MAX_BLOCK_TOKENS = 2048


def _round_up(x, m):
    return ((x + m - 1) // m) * m


def _pick_block_tokens(n_tokens, d_pad, vocab, small_path):
    """Token-tile size: ~2 MiB output tiles, multiple of 8, capped at 2048."""
    item = 4  # float32
    bt = _TARGET_TILE_BYTES // (d_pad * item)
    if small_path:
        # Also bound the (bt, V) one-hot intermediate to ~2 MiB.
        bt = min(bt, max(_SUBLANE, _TARGET_TILE_BYTES // (vocab * item)))
    bt = max(_SUBLANE, min(_MAX_BLOCK_TOKENS, bt))
    bt = (bt // _SUBLANE) * _SUBLANE
    bt = min(bt, _round_up(n_tokens, _SUBLANE))
    return bt


# ---------------------------------------------------------------------------
# Small-table fast path: table resident in VMEM, one-hot matmul on the MXU.
# ---------------------------------------------------------------------------
def _onehot_kernel(ids_ref, table_ref, out_ref):
    bt = out_ref.shape[0]
    vocab = table_ref.shape[0]
    ids = ids_ref[...]                                            # (bt, 1) int32
    iota = jax.lax.broadcasted_iota(jnp.int32, (bt, vocab), 1)    # (bt, V)
    onehot = (iota == ids).astype(table_ref.dtype)                # exact 0/1 selector
    out_ref[...] = jnp.dot(
        onehot, table_ref[...], preferred_element_type=jnp.float32
    ).astype(out_ref.dtype)


# ---------------------------------------------------------------------------
# Large-table path: table stays in HBM, per-token row DMA straight into the
# pipelined output tile.
# ---------------------------------------------------------------------------
def _gather_kernel(ids_ref, table_hbm, out_ref, sem, *, block_tokens):
    """ids_ref: (T_pad,) int32 in SMEM (scalar prefetch, pre-clamped).
    table_hbm: (V, D_pad) f32 left in HBM.  out_ref: (bt, D_pad) VMEM tile."""
    step = pl.program_id(0)
    base = step * block_tokens

    def issue(t, carry):
        tok = ids_ref[base + t]
        pltpu.make_async_copy(table_hbm.at[tok], out_ref.at[t], sem).start()
        return carry

    jax.lax.fori_loop(0, block_tokens, issue, 0, unroll=8)

    def drain(t, carry):
        # Every issued copy has identical byte size; wait once per copy with a
        # same-shaped descriptor (the dst shape determines the wait amount).
        pltpu.make_async_copy(table_hbm.at[0], out_ref.at[0], sem).wait()
        return carry

    jax.lax.fori_loop(0, block_tokens, drain, 0, unroll=8)


def embedding_forward(x, table):
    """x: integer ids of any shape; table: (V, D) float32. Returns x.shape + (D,)."""
    orig_shape = x.shape
    V, D = table.shape
    T = int(math.prod(orig_shape)) if orig_shape else 1

    # Lane-dense feature dim (unmasked row DMAs / output stores); sliced off later.
    D_pad = _round_up(D, _LANE)
    table_p = table if D_pad == D else jnp.pad(table, ((0, 0), (0, D_pad - D)))

    # Vectorized clamp in the wrapper (torch would raise on OOB ids; we clamp).
    ids = jnp.clip(x.reshape(-1).astype(jnp.int32), 0, V - 1)

    small_path = V * D_pad * 4 <= _SMALL_TABLE_BYTES
    bt = _pick_block_tokens(T, D_pad, V, small_path)
    T_pad = _round_up(max(T, 1), bt)
    if T_pad != T:
        ids = jnp.pad(ids, (0, T_pad - T))      # padded ids gather row 0, sliced off
    grid = (T_pad // bt,)

    # VMEM budget: double-buffered output tile (+ resident table + one-hot on
    # the fast path).  Always a few MiB, so safe on v7x's 64 MiB as well.
    est = 2 * bt * D_pad * 4
    if small_path:
        est += 2 * V * D_pad * 4 + bt * V * 4
    vmem_limit = int(min(64 * 1024 * 1024, max(32 * 1024 * 1024, 3 * est)))
    cparams = pltpu.CompilerParams(
        dimension_semantics=("parallel",),       # shard token tiles across TCs (v7x)
        vmem_limit_bytes=vmem_limit,
    )

    if small_path:
        ids2d = ids.reshape(T_pad, 1)
        out_flat = pl.pallas_call(
            _onehot_kernel,
            out_shape=jax.ShapeDtypeStruct((T_pad, D_pad), table.dtype),
            grid=grid,
            in_specs=[
                pl.BlockSpec((bt, 1), lambda i: (i, 0)),        # ids tile (VMEM)
                pl.BlockSpec((V, D_pad), lambda i: (0, 0)),     # table resident in VMEM
            ],
            out_specs=pl.BlockSpec((bt, D_pad), lambda i: (i, 0)),
            compiler_params=cparams,
        )(ids2d, table_p)
    else:
        out_flat = pl.pallas_call(
            partial(_gather_kernel, block_tokens=bt),
            out_shape=jax.ShapeDtypeStruct((T_pad, D_pad), table.dtype),
            grid_spec=pltpu.PrefetchScalarGridSpec(
                num_scalar_prefetch=1,                          # ids -> SMEM
                grid=grid,
                in_specs=[pl.BlockSpec(memory_space=pl.ANY)],   # table stays in HBM
                out_specs=pl.BlockSpec((bt, D_pad), lambda i, ids: (i, 0)),
                scratch_shapes=[pltpu.SemaphoreType.DMA],       # row-gather semaphore
            ),
            compiler_params=cparams,
        )(ids, table_p)

    return out_flat[:T, :D].reshape(*orig_shape, D)


class EmbeddingLayer:
    """JAX/Pallas mirror of the PyTorch EmbeddingLayer (nn.Embedding) module."""

    def __init__(self, input_dim, embedding_dim, key):
        # torch.nn.Embedding default init: weight ~ N(0, 1)
        self.table = jax.random.normal(
            key, (input_dim, embedding_dim), dtype=jnp.float32
        )

    def __call__(self, x):
        return embedding_forward(x, self.table)


if __name__ == "__main__":
    key = jax.random.PRNGKey(0)
    k_tbl, k_ids, k_tbl2, k_ids2 = jax.random.split(key, 4)

    # Small config consistent with the PyTorch module: vocab=64, hidden=32, (B,S)=(2,8).
    # This exercises the VMEM-resident one-hot/MXU fast path.
    input_dim, embedding_dim = 64, 32
    B, S = 2, 8
    layer = EmbeddingLayer(input_dim, embedding_dim, k_tbl)
    x = jax.random.randint(k_ids, (B, S), 0, input_dim, dtype=jnp.int32)
    out = jax.block_until_ready(layer(x))
    ref = jnp.take(layer.table, x, axis=0)
    assert out.shape == (B, S, embedding_dim)
    # one-hot selection via the MXU may carry a tiny f32-matmul rounding error
    assert jnp.allclose(out, ref, atol=1e-4, rtol=1e-4), "small-table path mismatch"

    # Larger vocab to exercise the HBM row-gather path (table > fast-path threshold).
    V2, D2 = 8192, 96
    B2, S2 = 2, 64
    table2 = jax.random.normal(k_tbl2, (V2, D2), dtype=jnp.float32)
    x2 = jax.random.randint(k_ids2, (B2, S2), 0, V2, dtype=jnp.int32)
    out2 = jax.block_until_ready(embedding_forward(x2, table2))
    ref2 = jnp.take(table2, x2, axis=0)
    assert out2.shape == (B2, S2, D2)
    assert jnp.allclose(out2, ref2, atol=1e-6), "gather path mismatch"

    print("KERNEL_OK")
</pallas_src>

<mosaic_0001>
module attributes {stable_mosaic.version = 11 : i64} {
  func.func @_onehot_kernel(%arg0: i32, %arg1: memref<16x1xi32, #tpu.memory_space<vmem>>, %arg2: memref<64x128xf32, #tpu.memory_space<vmem>>, %arg3: memref<16x128xf32, #tpu.memory_space<vmem>>) attributes {dimension_semantics = [#tpu.dimension_semantics<parallel>], iteration_bounds = array<i64: 1>, scalar_prefetch = 0 : i64, scratch_operands = 0 : i64, tpu.core_type = #tpu.core_type<tc>, window_params = [{transform_indices = @transform_0, window_bounds = array<i64: 16, 1>}, {pipeline_mode = #tpu.pipeline_mode<synchronous>, transform_indices = @transform_1, window_bounds = array<i64: 64, 128>}, {transform_indices = @transform_2, window_bounds = array<i64: 16, 128>}]} {
    %c0 = arith.constant 0 : index
    %c0_0 = arith.constant 0 : index
    %0 = vector.load %arg1[%c0, %c0_0] : memref<16x1xi32, #tpu.memory_space<vmem>>, vector<16x1xi32>
    %1 = tpu.iota {dimensions = array<i32: 1>} : vector<16x64xi32>
    %2 = vector.broadcast %0 : vector<16x1xi32> to vector<16x64xi32>
    %3 = arith.cmpi eq, %1, %2 : vector<16x64xi32>
    %4 = arith.extui %3 : vector<16x64xi1> to vector<16x64xi32>
    %5 = arith.sitofp %4 : vector<16x64xi32> to vector<16x64xf32>
    %c0_1 = arith.constant 0 : index
    %c0_2 = arith.constant 0 : index
    %6 = vector.load %arg2[%c0_1, %c0_2] : memref<64x128xf32, #tpu.memory_space<vmem>>, vector<64x128xf32>
    %cst = arith.constant dense<0.000000e+00> : vector<16x128xf32>
    %7 = tpu.matmul %5, %6, %cst {dimension_numbers = #tpu.dot_dimension_numbers<[1], [0], [0], [1], [0, 0, 1, 1], [], []>} : vector<16x64xf32>, vector<64x128xf32>, vector<16x128xf32> -> vector<16x128xf32>
    %c0_3 = arith.constant 0 : index
    %c0_4 = arith.constant 0 : index
    %8 = vector.load %arg3[%c0_3, %c0_4] : memref<16x128xf32, #tpu.memory_space<vmem>>, vector<16x128xf32>
    tpu.vector_store %arg3[%c0_3, %c0_4], %7 {strides = array<i32>} : memref<16x128xf32, #tpu.memory_space<vmem>>, vector<16x128xf32>,
    return
  }
  func.func @transform_0(%arg0: i32) -> (i32, i32) {
    %c0_i32 = arith.constant 0 : i32
    %c0_i32_0 = arith.constant 0 : i32
    return %arg0, %c0_i32 : i32, i32
  }
  func.func @transform_1(%arg0: i32) -> (i32, i32) {
    %c0_i32 = arith.constant 0 : i32
    %c0_i32_0 = arith.constant 0 : i32
    %c0_i32_1 = arith.constant 0 : i32
    return %c0_i32, %c0_i32_0 : i32, i32
  }
  func.func @transform_2(%arg0: i32) -> (i32, i32) {
    %c0_i32 = arith.constant 0 : i32
    %c0_i32_0 = arith.constant 0 : i32
    return %arg0, %c0_i32 : i32, i32
  }
}

</mosaic_0001>

<bundles_post_ra>
// kernel: tpu_custom_call.1
= control target key start
LH: loop header
LB: loop body
LE: loop exit
PB: predicated region body
PF: predicated region fallthrough
CT: control target
= control target key end

     0   :  { %7 = vsyncpa [#allocation3], 0  ;;  %s312_s0 = inlined_call_operand.vmem [shape: s32[16,1], index: 0, kind: input, shape index: {}]   ;;  %s313_s1 = inlined_call_operand.hbm [shape: f32[64,128], index: 1, kind: input, shape index: {}]   ;;  %s314_s2 = inlined_call_operand.hbm [shape: f32[16,128], index: 2, kind: output, shape index: {}]  }
   0x1   :  { %8 = vsyncpa [#allocation4], 0  ;;  %s255_s9 = smov [#allocation2]   ;;  %s207_s13 = scalar_lea.hbm %s313_s1, 1024 }
   0x2   :  { %s16_s10 = sshll.u32 %s255_s9, 4  ;;  %p208_p0 = scmp.ne.s32.totalorder %s313_s1, %s207_s13  ;;  %s17_s10 = int_to_ptr.vmem [resolvable:$true] %s16_s10 }
   0x3   :  { %p211_p1 = scmp.lt.u32.totalorder %s207_s13, %s313_s1 }
   0x5   :  { %p213_p2 = pnand %p211_p1, %p208_p0 }
   0x7   :  { %216 = shalt.err (!%p213_p2)
}
   0x8   :  { %s217_s18 = scalar_lea.vmem %s17_s10, 1024  ;;  %p222_p4 = scmp.lt.s32.totalorder %s17_s10, %s17_s10 }
   0x9   :  { %p218_p3 = scmp.ne.s32.totalorder %s17_s10, %s217_s18  ;;  %p223_p5 = scmp.lt.s32.totalorder %s217_s18, %s217_s18 }
   0xb   :  { %p224_p6 = por %p223_p5, %p222_p4 }
   0xd   :  { %p225_p7 = pnand %p224_p6, %p218_p3 }
   0xf   :  { %228 = shalt.err (!%p225_p7)
}
  0x10   :  { %s256_s19 = smov 128   ;;  %s257_s20 = smov 8  }
  0x11   :  { %22 = dma.hbm_to_vmem [thread:$0]  %s313_s1, 1024, %s17_s10, [#allocation3], %s256_s19, %s256_s19, %s257_s20  }
  0x12   :  { %251 = dma.done.wait [#allocation3], 1024  }
  0x13   :  { %252 = vsyncadd [#allocation3], 4294966272  ;;  %v258_v0 = vmov 0   ;;  %v26_v1 = vld [vmem:[%s312_s0] sm:$0xff]  ;;  %v43_v3 = vld [vmem:[#allocation2 + $0x8] sm:$0xff]  ;;  %v28_v15 = vlaneseq  ;;  %vm50_vm0 = vcmask 523264  }
  0x14   :  { %206 = vset.pattern.permute.xlu0 %v258_v0  ;;  %v42_v2 = vld [vmem:[#allocation2] sm:$0xff]  ;;  %v44_v4 = vld [vmem:[#allocation2 + $0x10] sm:$0xff]  ;;  %v45_v5 = vld [vmem:[#allocation2 + $0x18] sm:$0xff]  ;;  %v259_v18 = vmov 0.0  }
  0x15   :  { %31 = vperm.xlu0 %206, %v26_v1   ;;  %v27_v6 = vld [vmem:[%s312_s0 + $0x8] sm:$0xff]  ;;  %v184_v7 = vpack.c.bf16 %v43_v3, %v42_v2  ;;  %v188_v8 = vpack.c.bf16 %v45_v5, %v44_v4  ;;  %v46_v9 = vld [vmem:[#allocation2 + $0x20] sm:$0xff]  ;;  %v48_v12 = vld [vmem:[#allocation2 + $0x30] sm:$0xff]  ;;  %v29_v16 = vand.u32 127, %v28_v15  ;;  %s260_s0 = smov [#allocation5]  }
  0x16   :  { %v47_v10 = vld [vmem:[#allocation2 + $0x28] sm:$0xff]  ;;  %v49_v13 = vld [vmem:[#allocation2 + $0x38] sm:$0xff]  ;;  %s139_s1 = sshll.u32 %s260_s0, 4  ;;  %s140_s1 = int_to_ptr.vmem [resolvable:$true] %s139_s1 }
  0x17   :  { %185 = vmatprep.subr.bf16.mxu0 %v184_v7  ;;  %v192_v11 = vpack.c.bf16 %v47_v10, %v46_v9  ;;  %v196_v14 = vpack.c.bf16 %v49_v13, %v48_v12  ;;  %s229_s27 = scalar_lea.vmem %s140_s1, 256  ;;  %p234_p9 = scmp.lt.s32.totalorder %s140_s1, %s140_s1 }
  0x18   :  { %187 = vmatpush3.bf16.msra.mxu0 %v184_v7  ;;  %p230_p8 = scmp.ne.s32.totalorder %s140_s1, %s229_s27  ;;  %p235_p10 = scmp.lt.s32.totalorder %s229_s27, %s229_s27 }
  0x19   :  { %34 = vperm.xlu0 %206, %v27_v6   ;;  %189 = vmatprep.subr.bf16.mxu0 %v188_v8 }
  0x1a   :  { %p236_p11 = por %p235_p10, %p234_p9 }
  0x1c   :  { %191 = vmatpush3.bf16.msra.mxu0 %v188_v8  ;;  %p237_p12 = pnand %p236_p11, %p230_p8 }
  0x1d   :  { %193 = vmatprep.subr.bf16.mxu0 %v192_v11 }
  0x20   :  { %195 = vmatpush3.bf16.msra.mxu0 %v192_v11 }
  0x21   :  { %197 = vmatprep.subr.bf16.mxu0 %v196_v14 }
  0x24   :  { %199 = vmatpush3.bf16.msra.mxu0 %v196_v14 }
  0x94   :  { %v32_v17 = vpop.permute.xlu0 %31 }
  0x95   :  { %vm36_vm1 = vcmp.eq.s32.totalorder %v29_v16, %v32_v17 }
  0x96   :  { %v151_v19 = vsel %vm36_vm1, 1.0, %v259_v18 }
  0x97   :  { %181 = vmatprep.mubr.msk.f32.mxu0 %vm50_vm0, %v151_v19 }
  0x98   :  { %v35_v20 = vpop.permute.xlu0 %34 }
  0x99   :  { %vm37_vm2 = vcmp.eq.s32.totalorder %v29_v16, %v35_v20 }
  0x9a   :  { %v152_v21 = vsel %vm37_vm2, 1.0, %v259_v18 }
  0x9b   :  { %182 = vmatmul.mubr.msk.f32.vlgmr.msra.gmra.mrb[0].mxu0 %vm50_vm0, %v152_v21 }
 0x16e   :  { %v183_v22 = vpop.f32.mrb[0].mxu0 }
 0x16f   :  { %133 = vst [vmem:[#allocation5 + $0x8] sm:$0xff] %v183_v22  ;;  %v123_v23 = vpop.f32.mrb[1].mxu0 }
 0x170   :  { %132 = vst [vmem:[#allocation5] sm:$0xff] %v123_v23 }
 0x171   :  { %240 = shalt.err (!%p237_p12)
}
 0x172   :  { %s241_s30 = scalar_lea.hbm %s314_s2, 256 }
 0x173   :  { %p242_p13 = scmp.ne.s32.totalorder %s314_s2, %s241_s30  ;;  %p245_p0 = scmp.lt.u32.totalorder %s241_s30, %s314_s2 }
 0x175   :  { %p247_p1 = pnand %p245_p0, %p242_p13 }
 0x177   :  { %250 = shalt.err (!%p247_p1)
}
 0x178   :  { %145 = dma.vmem_to_hbm [thread:$0]  %s140_s1, 256, %s314_s2, [#allocation4], %s256_s19, %s256_s19, %s257_s20  }
 0x179   :  { %253 = dma.done.wait [#allocation4], 256  }
 0x17a   :  { %254 = vsyncadd [#allocation4], 4294967040 }
 0x17b   :  { %149 = vsyncpa [#allocation3], 1 }
 0x17c   :  { %150 = vsyncpa [#allocation4], 1 }

</bundles_post_ra>
